<compile_context>
chip_gen: v6e
topology: v6e:2x2x1
jax: 0.10.0
libtpu: 0.0.40
codegen_flags: <defaults>
</compile_context>

<pallas_src>
import math

import jax
import jax.numpy as jnp
from jax.experimental import pallas as pl
from jax.experimental.pallas import tpu as pltpu

LANE = 128


def _ceil_to(x, m):
    return ((x + m - 1) // m) * m


# ----------------------------------------------------------------------------
# Fused kernel: CNN_Text (conv + ReLU + maxpool) + low-rank multimodal fusion
# ----------------------------------------------------------------------------
def tui_fused_kernel(text_ref, ui_ref,
                     wconv_ref, convb_ref,
                     uimat_ref, uibias_ref,
                     tmat_ref, tbias_ref,
                     red_ref, obias_ref,
                     out_ref):
    # text_ref : (TB, L, D)            wconv_ref: (K, D, Cop)    convb_ref: (1, Cop)
    # ui_ref   : (TB, 12+205)          uimat_ref: (217, 2*ROp)   uibias_ref: (1, 2*ROp)
    #   (uimat is block-diagonal: user rows -> cols [0,ROp), image rows -> [ROp,2*ROp))
    # tmat_ref : (Cop, ROp)            tbias_ref: (1, ROp)
    # red_ref  : (ROp, Opad)  (fusion_weights folded in)         obias_ref: (1, Opad)
    # out_ref  : (TB, Opad)
    K, _, Cop = wconv_ref.shape
    L = text_ref.shape[1]
    T = L - K + 1                      # narrow ("valid") conv output length
    ROp = tmat_ref.shape[1]
    f32 = jnp.float32

    # ---- CNN_Text: accumulate K shifted-window matmuls directly (no VMEM scratch) ----
    c = convb_ref[...].reshape(1, 1, Cop)                 # conv bias (f32, broadcast)
    for k in range(K):                                    # K is tiny -> static unroll
        c = c + jax.lax.dot_general(
            text_ref[:, k:k + T, :], wconv_ref[k],
            dimension_numbers=(((2,), (0,)), ((), ())),
            preferred_element_type=f32)                   # (TB, T, Cop)
    c = jnp.maximum(c, 0.0)                               # ReLU
    tfeat = jnp.max(c, axis=1)                            # max-pool over time -> (TB, Cop)
    # (dropout is eval-mode identity)

    # ---- Low-rank fusion ----
    # user + image modalities in ONE block-diagonal matmul, split at a 128-lane boundary.
    fui = jnp.dot(ui_ref[...], uimat_ref[...],
                  preferred_element_type=f32) + uibias_ref[...]          # (TB, 2*ROp)
    fu = fui[:, :ROp]
    fi = fui[:, ROp:]
    ft = jnp.dot(tfeat.astype(tmat_ref.dtype), tmat_ref[...],
                 preferred_element_type=f32) + tbias_ref[...]            # (TB, ROp)

    zy = fu * fi * ft                                     # (TB, ROp), full-lane

    # weighted sum over rank as one 128-lane matmul against the folded reduce matrix
    out_ref[...] = jnp.dot(zy.astype(red_ref.dtype), red_ref[...],
                           preferred_element_type=f32) + obias_ref[...]


# ----------------------------------------------------------------------------
# One-time parameter layout transformation (not per-call work)
# ----------------------------------------------------------------------------
def prepare_params(params, matmul_dtype=jnp.float32):
    """Lay parameters out for the fused kernel.

    * conv weight (K, D, Co) -> K slabs (K, D, Cop), Co zero-padded to 128 lanes
    * each factor's "ones" row folded into a per-modality bias
    * user & image factors fused into one block-diagonal (217, 2*ROp) matrix
    * fusion_weights folded into a structured (ROp, Opad) reduce matrix
    * matmul operands stored in `matmul_dtype` (pass jnp.bfloat16 on v6e/v7x to halve
      the text DMA stream); all biases / elementwise parameters stay f32.
    """
    mdt = matmul_dtype
    conv_w = params["conv_w"].astype(jnp.float32)         # (K, D, Co)
    K, D, Co = conv_w.shape
    Cop = max(LANE, _ceil_to(Co, LANE))
    wconv = jnp.zeros((K, D, Cop), mdt).at[:, :, :Co].set(conv_w.astype(mdt))
    convb = jnp.zeros((1, Cop), jnp.float32).at[:, :Co].set(params["conv_b"])

    R, _, O = params["user_factor"].shape
    RO = R * O
    ROp = max(LANE, _ceil_to(RO, LANE))
    Opad = max(LANE, _ceil_to(O, LANE))

    def split_factor(f, rows_out):
        # f: (R, F, O).  Row 0 is the "ones" column -> bias; rest -> (rows_out, ROp).
        F = f.shape[1]
        bias = jnp.zeros((1, ROp), jnp.float32).at[0, :RO].set(
            f[:, 0, :].reshape(RO).astype(jnp.float32))
        mat = jnp.zeros((rows_out, ROp), mdt).at[:F - 1, :RO].set(
            jnp.transpose(f[:, 1:, :], (1, 0, 2)).reshape(F - 1, RO).astype(mdt))
        return mat, bias

    uh = params["user_factor"].shape[1] - 1               # 12
    ih = params["image_factor"].shape[1] - 1               # 205
    umat, ubias = split_factor(params["user_factor"], uh)
    imat, ibias = split_factor(params["image_factor"], ih)
    tmat, tbias = split_factor(params["text_factor"], Cop)  # rows padded to Cop

    # block-diagonal [user | image] factor: one MXU pass over the concatenated input
    uimat = jnp.zeros((uh + ih, 2 * ROp), mdt)
    uimat = uimat.at[:uh, :ROp].set(umat).at[uh:, ROp:].set(imat)
    uibias = jnp.concatenate([ubias, ibias], axis=1)        # (1, 2*ROp), f32

    # reduce matrix: red[r*O + o', o] = fusion_weights[r] * (o' == o); padded.
    fw = params["fusion_weights"].reshape(R).astype(jnp.float32)
    eye = jnp.eye(O, dtype=jnp.float32)
    red = jnp.zeros((ROp, Opad), jnp.float32).at[:RO, :O].set(
        (fw[:, None, None] * eye[None, :, :]).reshape(RO, O)).astype(mdt)
    obias = jnp.zeros((1, Opad), jnp.float32).at[0, :O].set(params["fusion_bias"][0])

    return dict(wconv=wconv, convb=convb, uimat=uimat, uibias=uibias,
                tmat=tmat, tbias=tbias, red=red, obias=obias,
                out_dim=O, user_hidden=uh, image_hidden=ih)


# ----------------------------------------------------------------------------
# Hardware queries (best-effort, with safe fallbacks) and batch-tile heuristic
# ----------------------------------------------------------------------------
def _tpu_vmem_bytes(default=64 << 20):
    try:
        info = pltpu.get_tpu_info()
        for attr in ("vmem_capacity_bytes", "vmem_bytes", "vmem_size_bytes"):
            v = getattr(info, attr, None)
            if v:
                return int(v)
    except Exception:
        pass
    return default


def _num_tensorcores(default=1):
    try:
        info = pltpu.get_tpu_info()
        for attr in ("num_cores", "core_count", "num_tensorcores"):
            v = getattr(info, attr, None)
            if isinstance(v, int) and v > 0:
                return v
    except Exception:
        pass
    try:
        d = jax.devices()[0]
        for attr in ("num_cores", "core_count"):
            v = getattr(d, attr, None)
            if isinstance(v, int) and v > 0:
                return v
    except Exception:
        pass
    return default


def _choose_tb(B, per_row_bytes, fixed_bytes, budget_bytes, min_steps):
    """Even-split batch tile: multiple of 8 (f32 sublane) or the full batch."""
    if B <= 8:
        return B                          # one full-batch block (full-dim block is legal)
    n = max(1, min_steps)
    while True:
        tb = -(-B // n)                   # ceil: balanced tiles, no wasted tail step
        tb = min(_ceil_to(tb, 8), B)
        if tb <= 8 or fixed_bytes + tb * per_row_bytes <= budget_bytes:
            return tb
        n += 1


# ----------------------------------------------------------------------------
# Forward wrapper: single fused pallas_call with a parallel batch grid
# ----------------------------------------------------------------------------
def tui_forward(user, image, text, prepped, *, block_b=None):
    B, L, D = text.shape
    wconv, convb = prepped["wconv"], prepped["convb"]
    uimat, uibias = prepped["uimat"], prepped["uibias"]
    tmat, tbias = prepped["tmat"], prepped["tbias"]
    red, obias = prepped["red"], prepped["obias"]
    O = prepped["out_dim"]

    mdt = wconv.dtype
    in_item = jnp.dtype(mdt).itemsize
    K, _, Cop = wconv.shape
    T = L - K + 1
    UIH = uimat.shape[0]
    ROp2 = uimat.shape[1]
    ROp = tmat.shape[1]
    Opad = red.shape[1]
    assert user.shape[1] + image.shape[1] == UIH

    # Wrapper-side fusion of the two dense modalities (enables the block-diag matmul).
    ui = jnp.concatenate([user, image], axis=1).astype(mdt)
    text_c = text.astype(mdt)

    # ---- VMEM-budget-derived batch tile (respects v7x 64 MiB vs v5e/v6e 128 MiB) ----
    phys_vmem = _tpu_vmem_bytes()
    vmem_limit = int(max(32 << 20, min(100 << 20, 0.7 * phys_vmem)))
    weight_bytes = sum(int(a.size) * jnp.dtype(a.dtype).itemsize
                       for a in (wconv, convb, uimat, uibias, tmat, tbias, red, obias))
    fixed_bytes = 2 * weight_bytes + (2 << 20)          # double-buffered weights + slack
    per_row_bytes = (2 * L * D * in_item                # text block, double-buffered
                     + 2 * UIH * in_item                # [user|image] block
                     + 2 * Opad * 4                     # output block
                     + 2 * T * Cop * 4                  # conv intermediate (f32)
                     + (ROp2 + 3 * ROp + Opad) * 4)     # fusion temporaries
    min_steps = 2 if (_num_tensorcores() >= 2 and B > 8) else 1
    TB = block_b if block_b is not None else _choose_tb(
        B, per_row_bytes, fixed_bytes, int(0.8 * vmem_limit), min_steps)
    grid = (pl.cdiv(B, TB),)

    full2 = lambda b: (0, 0)
    in_specs = [
        pl.BlockSpec((TB, L, D), lambda b: (b, 0, 0)),      # text (streamed)
        pl.BlockSpec((TB, UIH), lambda b: (b, 0)),          # [user | image]
        pl.BlockSpec(wconv.shape, lambda b: (0, 0, 0)),     # conv weight slabs (K, D, Cop)
        pl.BlockSpec(convb.shape, full2),
        pl.BlockSpec(uimat.shape, full2),
        pl.BlockSpec(uibias.shape, full2),
        pl.BlockSpec(tmat.shape, full2),
        pl.BlockSpec(tbias.shape, full2),
        pl.BlockSpec(red.shape, full2),
        pl.BlockSpec(obias.shape, full2),
    ]
    out_spec = pl.BlockSpec((TB, Opad), lambda b: (b, 0))   # lane-dense (128-wide) output

    flops = 2 * B * (T * D * Cop * K + UIH * ROp2 + Cop * ROp + ROp * Opad)
    bytes_accessed = in_item * (text.size + ui.size) + 4 * B * Opad + weight_bytes
    cost = pl.CostEstimate(flops=int(flops), transcendentals=0,
                           bytes_accessed=int(bytes_accessed))

    out_padded = pl.pallas_call(
        tui_fused_kernel,
        out_shape=jax.ShapeDtypeStruct((B, Opad), jnp.float32),
        grid_spec=pltpu.PrefetchScalarGridSpec(
            num_scalar_prefetch=0,
            grid=grid,
            in_specs=in_specs,
            out_specs=out_spec,
        ),
        compiler_params=pltpu.CompilerParams(
            dimension_semantics=("parallel",),
            vmem_limit_bytes=vmem_limit),
        cost_estimate=cost,
    )(text_c, ui, wconv, convb, uimat, uibias, tmat, tbias, red, obias)

    return out_padded[:, :O]                                # (B, output_dim)


# ----------------------------------------------------------------------------
# Pure-JAX reference (mirrors the PyTorch forward, uses the RAW parameters)
# ----------------------------------------------------------------------------
def tui_reference(user, image, text, params):
    w, b = params["conv_w"], params["conv_b"]
    K = w.shape[0]
    B, L, D = text.shape
    T = L - K + 1
    acc = jnp.zeros((B, T, w.shape[-1]), jnp.float32)
    for k in range(K):
        acc = acc + jnp.einsum("btd,dc->btc", text[:, k:k + T, :], w[k])
    acc = jnp.maximum(acc + b.reshape(1, 1, -1), 0.0)
    text_feat = jnp.max(acc, axis=1)

    ones = jnp.ones((B, 1), jnp.float32)
    _text = jnp.concatenate([ones, text_feat], axis=1)
    _image = jnp.concatenate([ones, image], axis=1)
    _user = jnp.concatenate([ones, user], axis=1)

    fusion_text = jnp.einsum("bk,rko->rbo", _text, params["text_factor"])
    fusion_image = jnp.einsum("bk,rko->rbo", _image, params["image_factor"])
    fusion_user = jnp.einsum("bk,rko->rbo", _user, params["user_factor"])
    fusion_zy = fusion_text * fusion_image * fusion_user        # (R, B, O)
    out = jnp.einsum("r,rbo->bo", params["fusion_weights"][0], fusion_zy)
    return out + params["fusion_bias"]


# ----------------------------------------------------------------------------
# Deterministic synthetic parameters (xavier-normal-style, matches module init)
# ----------------------------------------------------------------------------
def make_params(key, *, embed_dim, kernel_num, kernel_size, rank,
                user_hidden, image_hidden, output_dim, init_weight_value=1.0):
    ks = jax.random.split(key, 8)
    D, Co, K = embed_dim, kernel_num, kernel_size

    # conv weight: PyTorch (Co, 1, K, D) -> ours (K, D, Co); xavier_normal gain=sqrt(v)
    fan_in, fan_out = 1 * K * D, Co * K * D
    std = math.sqrt(init_weight_value) * math.sqrt(2.0 / (fan_in + fan_out))
    conv_w = std * jax.random.normal(ks[0], (K, D, Co), jnp.float32)
    conv_b = 0.01 * jax.random.normal(ks[1], (1, Co), jnp.float32)

    def xavier3(k, shape):
        r, n, o = shape
        s = math.sqrt(2.0 / (n * o + r * o))
        return s * jax.random.normal(k, shape, jnp.float32)

    user_factor = xavier3(ks[2], (rank, user_hidden + 1, output_dim))
    image_factor = xavier3(ks[3], (rank, image_hidden + 1, output_dim))
    text_factor = xavier3(ks[4], (rank, Co + 1, output_dim))
    fw_std = math.sqrt(2.0 / (rank + 1))
    fusion_weights = fw_std * jax.random.normal(ks[5], (1, rank), jnp.float32)
    fusion_bias = jnp.zeros((1, output_dim), jnp.float32)

    return dict(conv_w=conv_w, conv_b=conv_b, user_factor=user_factor,
                image_factor=image_factor, text_factor=text_factor,
                fusion_weights=fusion_weights, fusion_bias=fusion_bias)


if __name__ == "__main__":
    # small shapes
    B, L, D = 2, 8, 32            # batch, seq len, embed dim
    Co, K = 16, 3                 # kernel_num, kernel_size (kernel_sizes=[3])
    RANK, OUT = 4, 8              # low-rank fusion rank, output_dim
    USER_H, IMG_H = 12, 205       # fixed in the module

    key = jax.random.PRNGKey(0)
    k_u, k_i, k_t, k_p = jax.random.split(key, 4)
    user = jax.random.normal(k_u, (B, USER_H), jnp.float32)
    image = jax.random.normal(k_i, (B, IMG_H), jnp.float32)
    text = jax.random.normal(k_t, (B, L, D), jnp.float32)

    params = make_params(k_p, embed_dim=D, kernel_num=Co, kernel_size=K,
                         rank=RANK, user_hidden=USER_H, image_hidden=IMG_H,
                         output_dim=OUT)
    # f32 operands for exact parity with the f32 reference; pass
    # matmul_dtype=jnp.bfloat16 here on v6e/v7x to halve the text DMA stream.
    prepped = prepare_params(params, matmul_dtype=jnp.float32)

    logit = tui_forward(user, image, text, prepped)
    logit = jax.block_until_ready(logit)

    ref = tui_reference(user, image, text, params)
    assert logit.shape == (B, OUT), logit.shape
    assert jnp.allclose(logit, ref, atol=1e-4, rtol=1e-4), (
        "mismatch vs reference:\n%s\n%s" % (logit, ref))

    print("KERNEL_OK")
</pallas_src>

<mosaic_0001>
module attributes {stable_mosaic.version = 11 : i64} {
  func.func @tui_fused_kernel(%arg0: i32, %arg1: memref<2x8x32xf32, #tpu.memory_space<vmem>>, %arg2: memref<2x217xf32, #tpu.memory_space<vmem>>, %arg3: memref<3x32x128xf32, #tpu.memory_space<vmem>>, %arg4: memref<1x128xf32, #tpu.memory_space<vmem>>, %arg5: memref<217x256xf32, #tpu.memory_space<vmem>>, %arg6: memref<1x256xf32, #tpu.memory_space<vmem>>, %arg7: memref<128x128xf32, #tpu.memory_space<vmem>>, %arg8: memref<1x128xf32, #tpu.memory_space<vmem>>, %arg9: memref<128x128xf32, #tpu.memory_space<vmem>>, %arg10: memref<1x128xf32, #tpu.memory_space<vmem>>, %arg11: memref<2x128xf32, #tpu.memory_space<vmem>>) attributes {dimension_semantics = [#tpu.dimension_semantics<parallel>], iteration_bounds = array<i64: 1>, scalar_prefetch = 0 : i64, scratch_operands = 0 : i64, tpu.core_type = #tpu.core_type<tc>, window_params = [{transform_indices = @transform_0, window_bounds = array<i64: 2, 8, 32>}, {transform_indices = @transform_1, window_bounds = array<i64: 2, 217>}, {pipeline_mode = #tpu.pipeline_mode<synchronous>, transform_indices = @transform_2, window_bounds = array<i64: 3, 32, 128>}, {pipeline_mode = #tpu.pipeline_mode<synchronous>, transform_indices = @transform_3, window_bounds = array<i64: 1, 128>}, {pipeline_mode = #tpu.pipeline_mode<synchronous>, transform_indices = @transform_4, window_bounds = array<i64: 217, 256>}, {pipeline_mode = #tpu.pipeline_mode<synchronous>, transform_indices = @transform_5, window_bounds = array<i64: 1, 256>}, {pipeline_mode = #tpu.pipeline_mode<synchronous>, transform_indices = @transform_6, window_bounds = array<i64: 128, 128>}, {pipeline_mode = #tpu.pipeline_mode<synchronous>, transform_indices = @transform_7, window_bounds = array<i64: 1, 128>}, {pipeline_mode = #tpu.pipeline_mode<synchronous>, transform_indices = @transform_8, window_bounds = array<i64: 128, 128>}, {pipeline_mode = #tpu.pipeline_mode<synchronous>, transform_indices = @transform_9, window_bounds = array<i64: 1, 128>}, {transform_indices = @transform_10, window_bounds = array<i64: 2, 128>}]} {
    %c0 = arith.constant 0 : index
    %c0_0 = arith.constant 0 : index
    %0 = vector.load %arg4[%c0, %c0_0] : memref<1x128xf32, #tpu.memory_space<vmem>>, vector<1x128xf32>
    %1 = vector.shape_cast %0 : vector<1x128xf32> to vector<1x1x128xf32>
    %c0_1 = arith.constant 0 : index
    %c0_2 = arith.constant 0 : index
    %c0_3 = arith.constant 0 : index
    %2 = vector.load %arg1[%c0_1, %c0_2, %c0_3] : memref<2x8x32xf32, #tpu.memory_space<vmem>>, vector<2x6x32xf32>
    %c0_4 = arith.constant 0 : index
    %c0_5 = arith.constant 0 : index
    %c0_6 = arith.constant 0 : index
    %3 = vector.load %arg3[%c0_4, %c0_5, %c0_6] : memref<3x32x128xf32, #tpu.memory_space<vmem>>, vector<1x32x128xf32>
    %4 = vector.shape_cast %3 : vector<1x32x128xf32> to vector<32x128xf32>
    %cst = arith.constant dense<0.000000e+00> : vector<2x6x128xf32>
    %5 = tpu.matmul %2, %4, %cst {dimension_numbers = #tpu.dot_dimension_numbers<[2], [0], [0, 1], [1], [0, 0, 0, 1, 1, 1], [], []>} : vector<2x6x32xf32>, vector<32x128xf32>, vector<2x6x128xf32> -> vector<2x6x128xf32>
    %6 = vector.broadcast %1 : vector<1x1x128xf32> to vector<2x6x128xf32>
    %7 = arith.addf %6, %5 : vector<2x6x128xf32>
    %c0_7 = arith.constant 0 : index
    %c1 = arith.constant 1 : index
    %c0_8 = arith.constant 0 : index
    %8 = vector.load %arg1[%c0_7, %c1, %c0_8] : memref<2x8x32xf32, #tpu.memory_space<vmem>>, vector<2x6x32xf32>
    %c1_9 = arith.constant 1 : index
    %c0_10 = arith.constant 0 : index
    %c0_11 = arith.constant 0 : index
    %9 = vector.load %arg3[%c1_9, %c0_10, %c0_11] : memref<3x32x128xf32, #tpu.memory_space<vmem>>, vector<1x32x128xf32>
    %10 = vector.shape_cast %9 : vector<1x32x128xf32> to vector<32x128xf32>
    %cst_12 = arith.constant dense<0.000000e+00> : vector<2x6x128xf32>
    %11 = tpu.matmul %8, %10, %cst_12 {dimension_numbers = #tpu.dot_dimension_numbers<[2], [0], [0, 1], [1], [0, 0, 0, 1, 1, 1], [], []>} : vector<2x6x32xf32>, vector<32x128xf32>, vector<2x6x128xf32> -> vector<2x6x128xf32>
    %12 = arith.addf %7, %11 : vector<2x6x128xf32>
    %c0_13 = arith.constant 0 : index
    %c2 = arith.constant 2 : index
    %c0_14 = arith.constant 0 : index
    %13 = vector.load %arg1[%c0_13, %c2, %c0_14] : memref<2x8x32xf32, #tpu.memory_space<vmem>>, vector<2x6x32xf32>
    %c2_15 = arith.constant 2 : index
    %c0_16 = arith.constant 0 : index
    %c0_17 = arith.constant 0 : index
    %14 = vector.load %arg3[%c2_15, %c0_16, %c0_17] : memref<3x32x128xf32, #tpu.memory_space<vmem>>, vector<1x32x128xf32>
    %15 = vector.shape_cast %14 : vector<1x32x128xf32> to vector<32x128xf32>
    %cst_18 = arith.constant dense<0.000000e+00> : vector<2x6x128xf32>
    %16 = tpu.matmul %13, %15, %cst_18 {dimension_numbers = #tpu.dot_dimension_numbers<[2], [0], [0, 1], [1], [0, 0, 0, 1, 1, 1], [], []>} : vector<2x6x32xf32>, vector<32x128xf32>, vector<2x6x128xf32> -> vector<2x6x128xf32>
    %17 = arith.addf %12, %16 : vector<2x6x128xf32>
    %cst_19 = arith.constant 0.000000e+00 : f32
    %18 = vector.broadcast %cst_19 : f32 to vector<2x6x128xf32>
    %19 = arith.maximumf %17, %18 : vector<2x6x128xf32>
    %cst_20 = arith.constant dense<0xFF800000> : vector<2x128xf32>
    %20 = vector.multi_reduction <maximumf>, %19, %cst_20 [1] : vector<2x6x128xf32> to vector<2x128xf32>
    %c0_21 = arith.constant 0 : index
    %c0_22 = arith.constant 0 : index
    %21 = vector.load %arg2[%c0_21, %c0_22] : memref<2x217xf32, #tpu.memory_space<vmem>>, vector<2x217xf32>
    %c0_23 = arith.constant 0 : index
    %c0_24 = arith.constant 0 : index
    %22 = vector.load %arg5[%c0_23, %c0_24] : memref<217x256xf32, #tpu.memory_space<vmem>>, vector<217x256xf32>
    %cst_25 = arith.constant dense<0.000000e+00> : vector<2x256xf32>
    %23 = tpu.matmul %21, %22, %cst_25 {dimension_numbers = #tpu.dot_dimension_numbers<[1], [0], [0], [1], [0, 0, 1, 1], [], []>} : vector<2x217xf32>, vector<217x256xf32>, vector<2x256xf32> -> vector<2x256xf32>
    %c0_26 = arith.constant 0 : index
    %c0_27 = arith.constant 0 : index
    %24 = vector.load %arg6[%c0_26, %c0_27] : memref<1x256xf32, #tpu.memory_space<vmem>>, vector<1x256xf32>
    %25 = vector.broadcast %24 : vector<1x256xf32> to vector<2x256xf32>
    %26 = arith.addf %23, %25 : vector<2x256xf32>
    %27 = vector.extract_strided_slice %26 {offsets = [0, 0], sizes = [2, 128], strides = [1, 1]} : vector<2x256xf32> to vector<2x128xf32>
    %28 = vector.extract_strided_slice %26 {offsets = [0, 128], sizes = [2, 128], strides = [1, 1]} : vector<2x256xf32> to vector<2x128xf32>
    %c0_28 = arith.constant 0 : index
    %c0_29 = arith.constant 0 : index
    %29 = vector.load %arg7[%c0_28, %c0_29] : memref<128x128xf32, #tpu.memory_space<vmem>>, vector<128x128xf32>
    %cst_30 = arith.constant dense<0.000000e+00> : vector<2x128xf32>
    %30 = tpu.matmul %20, %29, %cst_30 {dimension_numbers = #tpu.dot_dimension_numbers<[1], [0], [0], [1], [0, 0, 1, 1], [], []>} : vector<2x128xf32>, vector<128x128xf32>, vector<2x128xf32> -> vector<2x128xf32>
    %c0_31 = arith.constant 0 : index
    %c0_32 = arith.constant 0 : index
    %31 = vector.load %arg8[%c0_31, %c0_32] : memref<1x128xf32, #tpu.memory_space<vmem>>, vector<1x128xf32>
    %32 = vector.broadcast %31 : vector<1x128xf32> to vector<2x128xf32>
    %33 = arith.addf %30, %32 : vector<2x128xf32>
    %34 = arith.mulf %27, %28 : vector<2x128xf32>
    %35 = arith.mulf %34, %33 : vector<2x128xf32>
    %c0_33 = arith.constant 0 : index
    %c0_34 = arith.constant 0 : index
    %36 = vector.load %arg9[%c0_33, %c0_34] : memref<128x128xf32, #tpu.memory_space<vmem>>, vector<128x128xf32>
    %cst_35 = arith.constant dense<0.000000e+00> : vector<2x128xf32>
    %37 = tpu.matmul %35, %36, %cst_35 {dimension_numbers = #tpu.dot_dimension_numbers<[1], [0], [0], [1], [0, 0, 1, 1], [], []>} : vector<2x128xf32>, vector<128x128xf32>, vector<2x128xf32> -> vector<2x128xf32>
    %c0_36 = arith.constant 0 : index
    %c0_37 = arith.constant 0 : index
    %38 = vector.load %arg10[%c0_36, %c0_37] : memref<1x128xf32, #tpu.memory_space<vmem>>, vector<1x128xf32>
    %39 = vector.broadcast %38 : vector<1x128xf32> to vector<2x128xf32>
    %40 = arith.addf %37, %39 : vector<2x128xf32>
    %c0_38 = arith.constant 0 : index
    %c0_39 = arith.constant 0 : index
    %41 = vector.load %arg11[%c0_38, %c0_39] : memref<2x128xf32, #tpu.memory_space<vmem>>, vector<2x128xf32>
    tpu.vector_store %arg11[%c0_38, %c0_39], %40 {strides = array<i32>} : memref<2x128xf32, #tpu.memory_space<vmem>>, vector<2x128xf32>,
    return
  }
  func.func @transform_0(%arg0: i32) -> (i32, i32, i32) {
    %c0_i32 = arith.constant 0 : i32
    %c0_i32_0 = arith.constant 0 : i32
    %c0_i32_1 = arith.constant 0 : i32
    return %arg0, %c0_i32, %c0_i32_0 : i32, i32, i32
  }
  func.func @transform_1(%arg0: i32) -> (i32, i32) {
    %c0_i32 = arith.constant 0 : i32
    %c0_i32_0 = arith.constant 0 : i32
    return %arg0, %c0_i32 : i32, i32
  }
  func.func @transform_2(%arg0: i32) -> (i32, i32, i32) {
    %c0_i32 = arith.constant 0 : i32
    %c0_i32_0 = arith.constant 0 : i32
    %c0_i32_1 = arith.constant 0 : i32
    %c0_i32_2 = arith.constant 0 : i32
    return %c0_i32, %c0_i32_0, %c0_i32_1 : i32, i32, i32
  }
  func.func @transform_3(%arg0: i32) -> (i32, i32) {
    %c0_i32 = arith.constant 0 : i32
    %c0_i32_0 = arith.constant 0 : i32
    %c0_i32_1 = arith.constant 0 : i32
    return %c0_i32, %c0_i32_0 : i32, i32
  }
  func.func @transform_4(%arg0: i32) -> (i32, i32) {
    %c0_i32 = arith.constant 0 : i32
    %c0_i32_0 = arith.constant 0 : i32
    %c0_i32_1 = arith.constant 0 : i32
    return %c0_i32, %c0_i32_0 : i32, i32
  }
  func.func @transform_5(%arg0: i32) -> (i32, i32) {
    %c0_i32 = arith.constant 0 : i32
    %c0_i32_0 = arith.constant 0 : i32
    %c0_i32_1 = arith.constant 0 : i32
    return %c0_i32, %c0_i32_0 : i32, i32
  }
  func.func @transform_6(%arg0: i32) -> (i32, i32) {
    %c0_i32 = arith.constant 0 : i32
    %c0_i32_0 = arith.constant 0 : i32
    %c0_i32_1 = arith.constant 0 : i32
    return %c0_i32, %c0_i32_0 : i32, i32
  }
  func.func @transform_7(%arg0: i32) -> (i32, i32) {
    %c0_i32 = arith.constant 0 : i32
    %c0_i32_0 = arith.constant 0 : i32
    %c0_i32_1 = arith.constant 0 : i32
    return %c0_i32, %c0_i32_0 : i32, i32
  }
  func.func @transform_8(%arg0: i32) -> (i32, i32) {
    %c0_i32 = arith.constant 0 : i32
    %c0_i32_0 = arith.constant 0 : i32
    %c0_i32_1 = arith.constant 0 : i32
    return %c0_i32, %c0_i32_0 : i32, i32
  }
  func.func @transform_9(%arg0: i32) -> (i32, i32) {
    %c0_i32 = arith.constant 0 : i32
    %c0_i32_0 = arith.constant 0 : i32
    %c0_i32_1 = arith.constant 0 : i32
    return %c0_i32, %c0_i32_0 : i32, i32
  }
  func.func @transform_10(%arg0: i32) -> (i32, i32) {
    %c0_i32 = arith.constant 0 : i32
    %c0_i32_0 = arith.constant 0 : i32
    return %arg0, %c0_i32 : i32, i32
  }
}

</mosaic_0001>

<bundles_post_ra>
// kernel: tpu_custom_call.1
= control target key start
LH: loop header
LB: loop body
LE: loop exit
PB: predicated region body
PF: predicated region fallthrough
CT: control target
= control target key end

     0   :  { %15 = vsyncpa [#allocation3], 0  ;;  %s1679_s0 = inlined_call_operand.hbm [shape: f32[2,8,32], index: 0, kind: input, shape index: {}]   ;;  %s1680_s1 = inlined_call_operand.hbm [shape: f32[2,217], index: 1, kind: input, shape index: {}]   ;;  %s1681_s2 = inlined_call_operand.hbm [shape: f32[3,32,128], index: 2, kind: input, shape index: {}]   ;;  %s1682_s3 = inlined_call_operand.vmem [shape: f32[1,128], index: 3, kind: input, shape index: {}]   ;;  %s1683_s4 = inlined_call_operand.hbm [shape: f32[217,256], index: 4, kind: input, shape index: {}]   ;;  %s1684_s5 = inlined_call_operand.vmem [shape: f32[1,256], index: 5, kind: input, shape index: {}]   ;;  %s1685_s6 = inlined_call_operand.hbm [shape: f32[128,128], index: 6, kind: input, shape index: {}]   ;;  %s1686_s7 = inlined_call_operand.vmem [shape: f32[1,128], index: 7, kind: input, shape index: {}]   ;;  %s1687_s8 = inlined_call_operand.hbm [shape: f32[128,128], index: 8, kind: input, shape index: {}]   ;;  %s1688_s9 = inlined_call_operand.vmem [shape: f32[1,128], index: 9, kind: input, shape index: {}]   ;;  %s1689_s10 = inlined_call_operand.hbm [shape: f32[2,128], index: 10, kind: output, shape index: {}]  }
   0x1   :  { %16 = vsyncpa [#allocation6], 0 }
   0x2   :  { %17 = vsyncpa [#allocation9], 0 }
   0x3   :  { %18 = vsyncpa [#allocation12], 0 }
   0x4   :  { %19 = vsyncpa [#allocation4], 0  ;;  %s1474_s13 = smov [#allocation5]   ;;  %s1475_s15 = smov [#allocation8]  }
   0x5   :  { %s38_s14 = sshll.u32 %s1474_s13, 4  ;;  %s61_s16 = sshll.u32 %s1475_s15, 4  ;;  %s39_s14 = int_to_ptr.vmem [resolvable:$true] %s38_s14  ;;  %s62_s16 = int_to_ptr.vmem [resolvable:$true] %s61_s16 }
   0x6   :  { %s1332_s17 = scalar_lea.vmem %s39_s14, 64  ;;  %p1337_p1 = scmp.lt.s32.totalorder %s39_s14, %s39_s14 }
   0x7   :  { %p1333_p0 = scmp.ne.s32.totalorder %s39_s14, %s1332_s17  ;;  %p1338_p2 = scmp.lt.s32.totalorder %s1332_s17, %s1332_s17 }
   0x9   :  { %p1339_p3 = por %p1338_p2, %p1337_p1 }
   0xb   :  { %p1340_p4 = pnand %p1339_p3, %p1333_p0 }
   0xd   :  { %1343 = shalt.err (!%p1340_p4)
}
   0xe   :  { %41 = dma.hbm_to_vmem [thread:$0]  %s1680_s1, 64, %s39_s14, [#allocation6]  }
   0xf   :  { %s1352_s20 = scalar_lea.vmem %s62_s16, 7168  ;;  %p1357_p6 = scmp.lt.s32.totalorder %s62_s16, %s62_s16 }
  0x10   :  { %p1353_p5 = scmp.ne.s32.totalorder %s62_s16, %s1352_s20  ;;  %p1358_p7 = scmp.lt.s32.totalorder %s1352_s20, %s1352_s20 }
  0x12   :  { %p1359_p8 = por %p1358_p7, %p1357_p6 }
  0x14   :  { %p1360_p9 = pnand %p1359_p8, %p1353_p5 }
  0x16   :  { %1363 = shalt.err (!%p1360_p9)
}
  0x17   :  { %s1476_s21 = smov 256   ;;  %s1477_s22 = smov 16  }
  0x18   :  { %67 = dma.hbm_to_vmem [thread:$0]  %s1683_s4, 7168, %s62_s16, [#allocation9], %s1476_s21, %s1476_s21, %s1477_s22  }
  0x19   :  { %s1478_s25 = smov [#allocation2]  }
  0x1a   :  { %s25_s26 = sshll.u32 %s1478_s25, 4  ;;  %s26_s26 = int_to_ptr.vmem [resolvable:$true] %s25_s26 }
  0x1b   :  { %s1372_s27 = scalar_lea.vmem %s26_s26, 256  ;;  %p1377_p11 = scmp.lt.s32.totalorder %s26_s26, %s26_s26 }
  0x1c   :  { %p1373_p10 = scmp.ne.s32.totalorder %s26_s26, %s1372_s27  ;;  %p1378_p12 = scmp.lt.s32.totalorder %s1372_s27, %s1372_s27 }
  0x1e   :  { %p1379_p13 = por %p1378_p12, %p1377_p11 }
  0x20   :  { %p1380_p0 = pnand %p1379_p13, %p1373_p10 }
  0x22   :  { %1383 = shalt.err (!%p1380_p0)
}
  0x23   :  { %s1479_s1 = smov 128   ;;  %s1480_s28 = smov 8  }
  0x24   :  { %31 = dma.hbm_to_vmem [thread:$0]  %s1679_s0, 256, %s26_s26, [#allocation3], %s1479_s1, %s1479_s1, %s1480_s28  }
  0x25   :  { %s1481_s4 = smov [#allocation7]   ;;  %s1482_s12 = smov [#allocation10]  }
  0x26   :  { %s47_s11 = sshll.u32 %s1481_s4, 4  ;;  %s75_s13 = sshll.u32 %s1482_s12, 4  ;;  %s48_s11 = int_to_ptr.vmem [resolvable:$true] %s47_s11  ;;  %s76_s13 = int_to_ptr.vmem [resolvable:$true] %s75_s13 }
  0x27   :  { %s1392_s14 = scalar_lea.vmem %s48_s11, 1536  ;;  %p1397_p2 = scmp.lt.s32.totalorder %s48_s11, %s48_s11 }
  0x28   :  { %p1393_p1 = scmp.ne.s32.totalorder %s48_s11, %s1392_s14  ;;  %p1398_p3 = scmp.lt.s32.totalorder %s1392_s14, %s1392_s14 }
  0x2a   :  { %p1399_p4 = por %p1398_p3, %p1397_p2 }
  0x2c   :  { %p1400_p5 = pnand %p1399_p4, %p1393_p1 }
  0x2e   :  { %1403 = shalt.err (!%p1400_p5)
}
  0x2f   :  { %53 = dma.hbm_to_vmem [thread:$0]  %s1681_s2, 1536, %s48_s11, [#allocation6], %s1479_s1, %s1479_s1, %s1480_s28  }
  0x30   :  { %s1412_s0 = scalar_lea.vmem %s76_s13, 2048  ;;  %p1417_p7 = scmp.lt.s32.totalorder %s76_s13, %s76_s13 }
  0x31   :  { %p1413_p6 = scmp.ne.s32.totalorder %s76_s13, %s1412_s0  ;;  %p1418_p8 = scmp.lt.s32.totalorder %s1412_s0, %s1412_s0 }
  0x33   :  { %p1419_p9 = por %p1418_p8, %p1417_p7 }
  0x35   :  { %p1420_p10 = pnand %p1419_p9, %p1413_p6 }
  0x37   :  { %1423 = shalt.err (!%p1420_p10)
}
  0x38   :  { %81 = dma.hbm_to_vmem [thread:$0]  %s1685_s6, 2048, %s76_s13, [#allocation9], %s1479_s1, %s1479_s1, %s1480_s28  }
  0x39   :  { %s1483_s19 = smov [#allocation11]  }
  0x3a   :  { %s89_s20 = sshll.u32 %s1483_s19, 4  ;;  %s90_s20 = int_to_ptr.vmem [resolvable:$true] %s89_s20 }
  0x3b   :  { %s1432_s21 = scalar_lea.vmem %s90_s20, 2048  ;;  %p1437_p12 = scmp.lt.s32.totalorder %s90_s20, %s90_s20 }
  0x3c   :  { %p1433_p11 = scmp.ne.s32.totalorder %s90_s20, %s1432_s21  ;;  %p1438_p13 = scmp.lt.s32.totalorder %s1432_s21, %s1432_s21 }
  0x3e   :  { %p1439_p0 = por %p1438_p13, %p1437_p12 }
  0x40   :  { %p1440_p1 = pnand %p1439_p0, %p1433_p11 }
  0x42   :  { %1443 = shalt.err (!%p1440_p1)
}
  0x43   :  { %95 = dma.hbm_to_vmem [thread:$0]  %s1687_s8, 2048, %s90_s20, [#allocation12], %s1479_s1, %s1479_s1, %s1480_s28  }
  0x44   :  { %1464 = dma.done.wait [#allocation3], 256  }
  0x45   :  { %1465 = vsyncadd [#allocation3], 4294967040 }
  0x46   :  { %1466 = dma.done.wait [#allocation6], 1600  }
  0x47   :  { %1467 = vsyncadd [#allocation6], 4294965696 }
  0x48   :  { %1468 = dma.done.wait [#allocation9], 9216  }
  0x49   :  { %1469 = vsyncadd [#allocation9], 4294958080 }
  0x4a   :  { %1470 = dma.done.wait [#allocation12], 2048  }
  0x4b   :  { %1471 = vsyncadd [#allocation12], 4294965248  ;;  %v129_v0 = vlaneseq  ;;  %v1484_v1 = vmov 1983009808   ;;  %v122_v6 = vld [vmem:[#allocation7 + $0x18] sm:$0xff]  ;;  %v121_v7 = vld [vmem:[#allocation7 + $0x10] sm:$0xff] }
  0x4c   :  { %v127_v2 = vunpack.c.l.s4 %v1484_v1  ;;  %1201 = vmatprep.subr.mxu1 %v122_v6  ;;  %v545_v8 = vld [vmem:[#allocation7 + $0x58] sm:$0xff]  ;;  %v544_v9 = vld [vmem:[#allocation7 + $0x50] sm:$0xff]  ;;  %v120_v10 = vld [vmem:[#allocation7 + $0x8] sm:$0xff]  ;;  %vm182_vm0 = vcmask 261120   ;;  %vm846_vm1 = vcmask 1040384   ;;  %vm843_vm2 = vcmask 728064  }
  0x4d   :  { %v1573_v3 = vshrl.u32 %v129_v0, 7  ;;  %1202 = vmatpush3.msra.mxu1 %v122_v6  ;;  %1223 = vmatprep.subr.mxu0 %v545_v8  ;;  %v117_v11 = vld [vmem:[#allocation2] sm:$0x3f]  ;;  %v118_v12 = vld [vmem:[#allocation2 + $0x8] sm:$0x3f]  ;;  %v119_v17 = vld [vmem:[#allocation7] sm:$0xff] }
  0x4e   :  { %v128_v4 = vunpack.c.0.s8 %v127_v2  ;;  %1203 = vmatprep.subr.mxu1 %v121_v7  ;;  %1224 = vmatpush3.msra.mxu0 %v545_v8  ;;  %v125_v13 = vcombine.high %v117_v11, %v117_v11  ;;  %v141_v15 = vcombine.high %v118_v12, %v118_v12  ;;  %v543_v16 = vld [vmem:[#allocation7 + $0x48] sm:$0xff]  ;;  %v540_v20 = vld [vmem:[#allocation2 + $0xa] sm:$0x3f]  ;;  %v542_v24 = vld [vmem:[#allocation7 + $0x40] sm:$0xff]  ;;  %vm1486_vm3 = vmmov 0  }
  0x4f   :  { %1204 = vmatpush3.msra.mxu1 %v121_v7  ;;  %1225 = vmatprep.subr.mxu0 %v544_v9  ;;  %v539_v19 = vld [vmem:[#allocation2 + $0x2] sm:$0x3f]  ;;  %v337_v26 = vld [vmem:[#allocation7 + $0x38] sm:$0xff]  ;;  %v564_v31 = vcombine.high %v540_v20, %v540_v20  ;;  %v334_v1 = vld [vmem:[#allocation7 + $0x20] sm:$0xff]  ;;  %vm749_vm4 = vcmask 1045504   ;;  %vm949_vm5 = vcmask 1041409  }
  0x50   :  { %v1576_v5 = vsub.s32 %v128_v4, %v1573_v3  ;;  %1205 = vmatprep.subr.mxu1 %v120_v10  ;;  %1226 = vmatpush3.msra.mxu0 %v544_v9  ;;  %v548_v27 = vcombine.high %v539_v19, %v539_v19  ;;  %v331_v32 = vld [vmem:[#allocation2 + $0x1] sm:$0x3f]  ;;  %v332_v39 = vld [vmem:[#allocation2 + $0x9] sm:$0x3f] }
  0x51   :  { %1206 = vmatpush3.msra.mxu1 %v120_v10  ;;  %1227 = vmatprep.subr.mxu0 %v543_v16  ;;  %v340_v43 = vcombine.high %v331_v32, %v331_v32  ;;  %v356_v50 = vcombine.high %v332_v39, %v332_v39  ;;  %v336_v52 = vld [vmem:[#allocation7 + $0x30] sm:$0xff]  ;;  %v335_v60 = vld [vmem:[#allocation7 + $0x28] sm:$0xff]  ;;  %v796_v7 = vld [vmem:[#allocation8 + $0xf8] sm:$0xff] }
  0x52   :  { %v132_v14 = vrot.slane %v117_v11, %v1576_v5  ;;  %v148_v18 = vrot.slane %v118_v12, %v1576_v5  ;;  %v139_v21 = vrot.slane %v125_v13, %v1576_v5  ;;  %v155_v23 = vrot.slane %v141_v15, %v1576_v5  ;;  %1207 = vmatprep.subr.mxu1 %v119_v17  ;;  %v795_v8 = vld [vmem:[#allocation8 + $0xf0] sm:$0xff]  ;;  %v794_v9 = vld [vmem:[#allocation8 + $0xe8] sm:$0xff]  ;;  %v793_v10 = vld [vmem:[#allocation8 + $0xe0] sm:$0xff] }
  0x53   :  { %v555_v28 = vrot.slane %v539_v19, %v1576_v5  ;;  %1228 = vmatpush3.msra.mxu0 %v543_v16  ;;  %1208 = vmatpush3.msra.mxu1 %v119_v17  ;;  %v562_v34 = vrot.slane %v548_v27, %v1576_v5  ;;  %v571_v38 = vrot.slane %v540_v20, %v1576_v5  ;;  %v792_v11 = vld [vmem:[#allocation8 + $0xd8] sm:$0xff]  ;;  %v791_v12 = vld [vmem:[#allocation8 + $0xd0] sm:$0xff]  ;;  %v790_v13 = vld [vmem:[#allocation8 + $0xc8] sm:$0xff] }
  0x54   :  { %v140_v22 = vcombine.high %v132_v14, %v132_v14  ;;  %v156_v25 = vcombine.high %v148_v18, %v148_v18  ;;  %v158_v30 = vcombine.low %v139_v21, %v148_v18  ;;  %1229 = vmatprep.subr.mxu0 %v542_v24  ;;  %1212 = vmatprep.subr.mxu1 %v337_v26  ;;  %v788_v15 = vld [vmem:[#allocation8 + $0xb8] sm:$0xff]  ;;  %v787_v16 = vld [vmem:[#allocation8 + $0xb0] sm:$0xff]  ;;  %v786_v17 = vld [vmem:[#allocation8 + $0xa8] sm:$0xff] }
  0x55   :  { %v563_v35 = vcombine.high %v555_v28, %v555_v28  ;;  %1230 = vmatpush3.msra.mxu0 %v542_v24  ;;  %v578_v42 = vrot.slane %v564_v31, %v1576_v5  ;;  %v579_v45 = vcombine.high %v571_v38, %v571_v38  ;;  %v581_v46 = vcombine.low %v562_v34, %v571_v38  ;;  %v785_v18 = vld [vmem:[#allocation8 + $0xa0] sm:$0xff]  ;;  %v784_v19 = vld [vmem:[#allocation8 + $0x98] sm:$0xff]  ;;  %v783_v20 = vld [vmem:[#allocation8 + $0x90] sm:$0xff] }
  0x56   :  { %v157_v29 = vcombine.low %v132_v14, %v140_v22  ;;  %v174_v33 = vcombine.low %v156_v25, %v155_v23  ;;  %v172_v37 = vrot.slane %v158_v30, %v1576_v5  ;;  %v347_v47 = vrot.slane %v331_v32, %v1576_v5  ;;  %v789_v14 = vld [vmem:[#allocation8 + $0xc0] sm:$0xff]  ;;  %v782_v21 = vld [vmem:[#allocation8 + $0x88] sm:$0xff]  ;;  %v780_v23 = vld [vmem:[#allocation8 + $0x78] sm:$0xff] }
  0x57   :  { %v580_v41 = vcombine.low %v555_v28, %v563_v35  ;;  %v354_v49 = vrot.slane %v340_v43, %v1576_v5  ;;  %v363_v51 = vrot.slane %v332_v39, %v1576_v5  ;;  %v595_v53 = vrot.slane %v581_v46, %v1576_v5  ;;  %v781_v22 = vld [vmem:[#allocation8 + $0x80] sm:$0xff]  ;;  %v779_v24 = vld [vmem:[#allocation8 + $0x70] sm:$0xff]  ;;  %v778_v25 = vld [vmem:[#allocation8 + $0x68] sm:$0xff] }
  0x58   :  { %v165_v36 = vrot.slane %v157_v29, %v1576_v5  ;;  %v181_v40 = vrot.slane %v174_v33, %v1576_v5  ;;  %v597_v54 = vcombine.low %v579_v45, %v578_v42  ;;  %v355_v55 = vcombine.high %v347_v47, %v347_v47  ;;  %v776_v27 = vld [vmem:[#allocation8 + $0x58] sm:$0xff]  ;;  %v775_v28 = vld [vmem:[#allocation8 + $0x50] sm:$0xff]  ;;  %v774_v29 = vld [vmem:[#allocation8 + $0x48] sm:$0xff] }
  0x59   :  { %v588_v48 = vrot.slane %v580_v41, %v1576_v5  ;;  %v371_v56 = vcombine.high %v363_v51, %v363_v51  ;;  %v373_v57 = vcombine.low %v354_v49, %v363_v51  ;;  %v370_v58 = vrot.slane %v356_v50, %v1576_v5  ;;  %v773_v30 = vld [vmem:[#allocation8 + $0x40] sm:$0xff]  ;;  %v772_v31 = vld [vmem:[#allocation8 + $0x38] sm:$0xff]  ;;  %v771_v32 = vld [vmem:[#allocation8 + $0x30] sm:$0xff] }
  0x5a   :  { %v173_v44 = vcombine.low %v165_v36, %v172_v37  ;;  %v604_v61 = vrot.slane %v597_v54, %v1576_v5  ;;  %v372_v62 = vcombine.low %v347_v47, %v355_v55  ;;  %v770_v33 = vld [vmem:[#allocation8 + $0x28] sm:$0xff]  ;;  %v769_v34 = vld [vmem:[#allocation8 + $0x20] sm:$0xff]  ;;  %v768_v35 = vld [vmem:[#allocation8 + $0x18] sm:$0xff]  ;;  %v1485_v38 = vmov 0.0  }
  0x5b   :  { %v596_v59 = vcombine.low %v588_v48, %v595_v53  ;;  %v387_v63 = vrot.slane %v373_v57, %v1576_v5  ;;  %v389_v0 = vcombine.low %v371_v56, %v370_v58  ;;  %v767_v36 = vld [vmem:[#allocation8 + $0x10] sm:$0xff]  ;;  %v766_v37 = vld [vmem:[#allocation8 + $0x8] sm:$0xff]  ;;  %1234 = vmatprep.subr.mxu0 %v1485_v38  ;;  %v765_v39 = vld [vmem:[#allocation8] sm:$0xff] }
  0x5c   :  { %1209 = vmatprep.mubr.msk.f32.mxu1 %vm182_vm0, %v173_v44  ;;  %v380_v2 = vrot.slane %v372_v62, %v1576_v5  ;;  %v820_v41 = vld [vmem:[#allocation8 + $0x1b8] sm:$0x1]  ;;  %v819_v42 = vld [vmem:[#allocation8 + $0x1b0] sm:$0x1]  ;;  %v818_v44 = vld [vmem:[#allocation8 + $0x1a8] sm:$0xff] }
  0x5d   :  { %1210 = vmatmul.mubr.msk.f32.vlgmr.msra.gmra.mxu1 %vm182_vm0, %v181_v40  ;;  %1231 = vmatprep.mubr.msk.f32.mxu0 %vm182_vm0, %v596_v59  ;;  %v396_v4 = vrot.slane %v389_v0, %v1576_v5  ;;  %v939_v40 = vld [vmem:[#allocation10 + $0x78] sm:$0xff]  ;;  %v938_v43 = vld [vmem:[#allocation10 + $0x70] sm:$0xff]  ;;  %v817_v45 = vld [vmem:[#allocation8 + $0x1a0] sm:$0xff] }
  0x5e   :  { %1213 = vmatpush3.msra.mxu1 %v337_v26  ;;  %1232 = vmatmul.mubr.msk.f32.vlgmr.msra.gmra.mxu0 %vm182_vm0, %v604_v61  ;;  %v388_v6 = vcombine.low %v380_v2, %v387_v63  ;;  %v777_v26 = vld [vmem:[#allocation8 + $0x60] sm:$0xff]  ;;  %v937_v46 = vld [vmem:[#allocation10 + $0x68] sm:$0xff]  ;;  %v816_v47 = vld [vmem:[#allocation8 + $0x198] sm:$0xff] }
  0x5f   :  { %1214 = vmatprep.subr.mxu1 %v336_v52  ;;  %1235 = vmatpush3.msra.mxu0 %v939_v40  ;;  %v815_v48 = vld [vmem:[#allocation8 + $0x190] sm:$0xff]  ;;  %v936_v49 = vld [vmem:[#allocation10 + $0x60] sm:$0xff]  ;;  %v814_v50 = vld [vmem:[#allocation8 + $0x188] sm:$0xff] }
  0x60   :  { %1215 = vmatpush3.msra.mxu1 %v336_v52  ;;  %1220 = vmatprep.mubr.msk.f32.mxu1 %vm182_vm0, %v388_v6  ;;  %v813_v51 = vld [vmem:[#allocation8 + $0x180] sm:$0xff]  ;;  %v935_v52 = vld [vmem:[#allocation10 + $0x58] sm:$0xff]  ;;  %v811_v54 = vld [vmem:[#allocation8 + $0x170] sm:$0xff] }
  0x61   :  { %1216 = vmatprep.subr.mxu1 %v335_v60  ;;  %1236 = vmatprep.subr.mxu0 %v1485_v38  ;;  %v812_v53 = vld [vmem:[#allocation8 + $0x178] sm:$0xff]  ;;  %v934_v55 = vld [vmem:[#allocation10 + $0x50] sm:$0xff]  ;;  %v810_v56 = vld [vmem:[#allocation8 + $0x168] sm:$0xff] }
  0x62   :  { %1217 = vmatpush3.msra.mxu1 %v335_v60  ;;  %1237 = vmatpush3.msra.mxu0 %v938_v43  ;;  %v809_v57 = vld [vmem:[#allocation8 + $0x160] sm:$0xff]  ;;  %v933_v58 = vld [vmem:[#allocation10 + $0x48] sm:$0xff]  ;;  %v808_v59 = vld [vmem:[#allocation8 + $0x158] sm:$0xff] }
  0x63   :  { %1218 = vmatprep.subr.mxu1 %v334_v1  ;;  %1238 = vmatprep.subr.mxu0 %v1485_v38  ;;  %v807_v60 = vld [vmem:[#allocation8 + $0x150] sm:$0xff]  ;;  %v932_v61 = vld [vmem:[#allocation10 + $0x40] sm:$0xff]  ;;  %v806_v62 = vld [vmem:[#allocation8 + $0x148] sm:$0xff] }
  0x64   :  { %1219 = vmatpush3.msra.mxu1 %v334_v1  ;;  %1239 = vmatpush3.msra.mxu0 %v937_v46  ;;  %v805_v63 = vld [vmem:[#allocation8 + $0x140] sm:$0xff]  ;;  %v931_v0 = vld [vmem:[#allocation10 + $0x38] sm:$0xff]  ;;  %v803_v2 = vld [vmem:[#allocation8 + $0x130] sm:$0xff] }
  0x65   :  { %1221 = vmatmul.mubr.msk.f32.vlgmr.msra.gmra.mxu1 %vm182_vm0, %v396_v4  ;;  %853 = vmatprep.subr.mxu1 %v796_v7  ;;  %v804_v1 = vld [vmem:[#allocation8 + $0x138] sm:$0xff]  ;;  %v930_v4 = vld [vmem:[#allocation10 + $0x30] sm:$0xff]  ;;  %v802_v6 = vld [vmem:[#allocation8 + $0x128] sm:$0xff] }
  0x66   :  { %854 = vmatpush1.msra.mxu1 %v795_v8  ;;  %1240 = vmatprep.subr.mxu0 %v1485_v38  ;;  %v801_v7 = vld [vmem:[#allocation8 + $0x120] sm:$0xff]  ;;  %v929_v8 = vld [vmem:[#allocation10 + $0x28] sm:$0xff] }
  0x67   :  { %855 = vmatprep.subr.mxu1 %v794_v9  ;;  %1241 = vmatpush3.msra.mxu0 %v936_v49  ;;  %v800_v9 = vld [vmem:[#allocation8 + $0x118] sm:$0xff] }
  0x68   :  { %856 = vmatpush1.msra.mxu1 %v793_v10  ;;  %1242 = vmatprep.subr.mxu0 %v1485_v38  ;;  %v1143_v10 = vld.sshfl [vmem:[#allocation5] sm:$0x33 pattern:$0x76325410] }
  0x69   :  { %857 = vmatprep.subr.mxu1 %v792_v11  ;;  %1243 = vmatpush3.msra.mxu0 %v935_v52  ;;  %v799_v11 = vld [vmem:[#allocation8 + $0x110] sm:$0xff] }
  0x6a   :  { %858 = vmatpush1.msra.mxu1 %v791_v12  ;;  %1244 = vmatprep.subr.mxu0 %v1485_v38  ;;  %v928_v12 = vld [vmem:[#allocation10 + $0x20] sm:$0xff] }
  0x6b   :  { %859 = vmatprep.subr.mxu1 %v790_v13  ;;  %1245 = vmatpush3.msra.mxu0 %v934_v55  ;;  %v798_v13 = vld [vmem:[#allocation8 + $0x108] sm:$0xff] }
  0x6c   :  { %860 = vmatpush1.msra.mxu1 %v789_v14  ;;  %1246 = vmatprep.subr.mxu0 %v1485_v38  ;;  %v841_v14 = vcombine.high %v1143_v10, %v1143_v10 }
  0x6d   :  { %861 = vmatprep.subr.mxu1 %v788_v15  ;;  %1247 = vmatpush3.msra.mxu0 %v933_v58  ;;  %v797_v15 = vld [vmem:[#allocation8 + $0x100] sm:$0xff]  ;;  %v1138_v58 = vld [vmem:[%s1682_s3] ss:$0 sm:$0xff] }
  0x6e   :  { %862 = vmatpush1.msra.mxu1 %v787_v16  ;;  %1248 = vmatprep.subr.mxu0 %v1485_v38  ;;  %v927_v16 = vld [vmem:[#allocation10 + $0x18] sm:$0xff] }
  0x6f   :  { %863 = vmatprep.subr.mxu1 %v786_v17  ;;  %1249 = vmatpush3.msra.mxu0 %v932_v61  ;;  %v926_v17 = vld [vmem:[#allocation10 + $0x10] sm:$0xff] }
  0x70   :  { %864 = vmatpush1.msra.mxu1 %v785_v18  ;;  %1250 = vmatprep.subr.mxu0 %v1485_v38  ;;  %v925_v18 = vld [vmem:[#allocation10 + $0x8] sm:$0xff] }
  0x71   :  { %865 = vmatprep.subr.mxu1 %v784_v19  ;;  %1251 = vmatpush3.msra.mxu0 %v931_v0  ;;  %v924_v19 = vld [vmem:[#allocation10] sm:$0xff] }
  0x72   :  { %866 = vmatpush1.msra.mxu1 %v783_v20  ;;  %1252 = vmatprep.subr.mxu0 %v1485_v38 }
  0x73   :  { %867 = vmatprep.subr.mxu1 %v782_v21  ;;  %1253 = vmatpush3.msra.mxu0 %v930_v4 }
  0x74   :  { %868 = vmatpush1.msra.mxu1 %v781_v22  ;;  %1254 = vmatprep.subr.mxu0 %v1485_v38 }
  0x75   :  { %869 = vmatprep.subr.mxu1 %v780_v23  ;;  %1255 = vmatpush3.msra.mxu0 %v929_v8 }
  0x76   :  { %870 = vmatpush1.msra.mxu1 %v779_v24  ;;  %1256 = vmatprep.subr.mxu0 %v1485_v38 }
  0x77   :  { %871 = vmatprep.subr.mxu1 %v778_v25  ;;  %1257 = vmatpush3.msra.mxu0 %v928_v12 }
  0x78   :  { %872 = vmatpush1.msra.mxu1 %v777_v26  ;;  %1258 = vmatprep.subr.mxu0 %v1485_v38 }
  0x79   :  { %873 = vmatprep.subr.mxu1 %v776_v27  ;;  %1146 = vmatprep.mubr.msk.f32.mxu1 %vm843_vm2, %v841_v14 }
  0x7a   :  { %874 = vmatpush1.msra.mxu1 %v775_v28  ;;  %1259 = vmatpush3.msra.mxu0 %v927_v16 }
  0x7b   :  { %875 = vmatprep.subr.mxu1 %v774_v29  ;;  %1260 = vmatprep.subr.mxu0 %v1485_v38 }
  0x7c   :  { %876 = vmatpush1.msra.mxu1 %v773_v30  ;;  %1266 = vmatprep.mubr.msk.f32.mxu0 %vm1486_vm3, %v1485_v38 }
  0x7d   :  { %877 = vmatprep.subr.mxu1 %v772_v31  ;;  %1261 = vmatpush3.msra.mxu0 %v926_v17 }
  0x7e   :  { %878 = vmatpush1.msra.mxu1 %v771_v32  ;;  %1262 = vmatprep.subr.mxu0 %v1485_v38 }
  0x7f   :  { %879 = vmatprep.subr.mxu1 %v770_v33  ;;  %1263 = vmatpush3.msra.mxu0 %v925_v18 }
  0x80   :  { %880 = vmatpush1.msra.mxu1 %v769_v34  ;;  %1264 = vmatprep.subr.mxu0 %v1485_v38 }
  0x81   :  { %881 = vmatprep.subr.mxu1 %v768_v35  ;;  %1265 = vmatpush3.msra.mxu0 %v924_v19 }
  0x82   :  { %882 = vmatpush1.msra.mxu1 %v767_v36  ;;  %1269 = vmatprep.subr.mxu0 %v1485_v38 }
  0x83   :  { %883 = vmatprep.subr.mxu1 %v766_v37 }
  0x84   :  { %884 = vmatpush1.msra.mxu1 %v765_v39 }
  0x85   :  { %1144 = vmatprep.subr.msk.mxu1 %vm846_vm1, %v820_v41 }
  0x86   :  { %1145 = vmatpush2.msk.msra.mxu1 %vm846_vm1, %v819_v42 }
  0x87   :  { %895 = vmatprep.subr.mxu1 %v818_v44 }
  0x88   :  { %896 = vmatpush2.msra.mxu1 %v817_v45 }
  0x89   :  { %897 = vmatprep.subr.mxu1 %v816_v47 }
  0x8a   :  { %898 = vmatpush2.msra.mxu1 %v815_v48 }
  0x8b   :  { %899 = vmatprep.subr.mxu1 %v814_v50 }
  0x8c   :  { %900 = vmatpush2.msra.mxu1 %v813_v51 }
  0x8d   :  { %901 = vmatprep.subr.mxu1 %v812_v53 }
  0x8e   :  { %902 = vmatpush2.msra.mxu1 %v811_v54 }
  0x8f   :  { %903 = vmatprep.subr.mxu1 %v810_v56 }
  0x90   :  { %904 = vmatpush2.msra.mxu1 %v809_v57 }
  0x91   :  { %905 = vmatprep.subr.mxu1 %v808_v59 }
  0x92   :  { %906 = vmatpush2.msra.mxu1 %v807_v60 }
  0x93   :  { %907 = vmatprep.subr.mxu1 %v806_v62 }
  0x94   :  { %908 = vmatpush2.msra.mxu1 %v805_v63 }
  0x95   :  { %909 = vmatprep.subr.mxu1 %v804_v1 }
  0x96   :  { %910 = vmatpush2.msra.mxu1 %v803_v2 }
  0x97   :  { %911 = vmatprep.subr.mxu1 %v802_v6 }
  0x98   :  { %912 = vmatpush2.msra.mxu1 %v801_v7 }
  0x99   :  { %913 = vmatprep.subr.mxu1 %v800_v9 }
  0x9a   :  { %914 = vmatpush2.msra.mxu1 %v799_v11 }
  0x9b   :  { %915 = vmatprep.subr.mxu1 %v798_v13 }
  0x9c   :  { %916 = vmatpush2.msra.mxu1 %v797_v15 }
  0x9d   :  { %918 = vmatmul.mubr.f32.vlgmr.msra.gmra.mxu1 %v1143_v10 }
 0x11d   :  { %v1211_v20 = vpop.f32.mrf.mxu1 }
 0x11e   :  { %v1233_v24 = vpop.f32.mrf.mxu0  ;;  %v287_v27 = vrot.slane %v1211_v20, %v1576_v5 }
 0x11f   :  { %v253_v21 = vpop.f32.mrf.mxu1  ;;  %v709_v40 = vrot.slane %v1233_v24, %v1576_v5 }
 0x120   :  { %v264_v22 = vcombine.high %v253_v21, %v253_v21  ;;  %v271_v23 = vrot.slane %v253_v21, %v1576_v5  ;;  %v675_v28 = vpop.f32.mrf.mxu0  ;;  %v288_v35 = vcombine.high %v287_v27, %v287_v27 }
 0x121   :  { %v686_v31 = vcombine.high %v675_v28, %v675_v28  ;;  %v693_v32 = vrot.slane %v675_v28, %v1576_v5  ;;  %v710_v52 = vcombine.high %v709_v40, %v709_v40 }
 0x122   :  { %v278_v25 = vrot.slane %v264_v22, %v1576_v5  ;;  %v279_v26 = vcombine.high %v271_v23, %v271_v23  ;;  %v325_v48 = vrot.slane %v288_v35, %v1576_v5  ;;  %v1037_v35 = vld [vmem:[#allocation11 + $0x68] sm:$0xff] }
 0x123   :  { %v700_v36 = vrot.slane %v686_v31, %v1576_v5  ;;  %v701_v37 = vcombine.high %v693_v32, %v693_v32  ;;  %v741_v1 = vrot.slane %v710_v52, %v1576_v5  ;;  %v821_v52 = vld [vmem:[%s1684_s5] sm:$0x3]  ;;  %s1487_s5 = smov [#allocation13]  }
 0x124   :  { %v280_v29 = vcombine.high %v278_v25, %v278_v25  ;;  %v295_v30 = vcombine.low %v271_v23, %v279_v26  ;;  %v309_v49 = vrot.slane %v278_v25, %v1576_v5  ;;  %s1124_s1 = sshll.u32 %s1487_s5, 4  ;;  %s1125_s1 = int_to_ptr.vmem [resolvable:$true] %s1124_s1 }
 0x125   :  { %v1222_v33 = vpop.f32.mrf.mxu1  ;;  %v702_v44 = vcombine.high %v700_v36, %v700_v36  ;;  %v711_v50 = vcombine.low %v693_v32, %v701_v37  ;;  %v725_v62 = vrot.slane %v700_v36, %v1576_v5  ;;  %v1039_v32 = vld [vmem:[#allocation11 + $0x78] sm:$0xff]  ;;  %v1036_v36 = vld [vmem:[#allocation11 + $0x60] sm:$0xff]  ;;  %s1444_s28 = scalar_lea.vmem %s1125_s1, 32  ;;  %p1449_p3 = scmp.lt.s32.totalorder %s1125_s1, %s1125_s1 }
 0x126   :  { %v311_v34 = vcombine.low %v280_v29, %v287_v27  ;;  %v501_v41 = vrot.slane %v1222_v33, %v1576_v5  ;;  %v302_v43 = vrot.slane %v295_v30, %v1576_v5  ;;  %v1035_v37 = vld [vmem:[#allocation11 + $0x58] sm:$0xff]  ;;  %p1445_p2 = scmp.ne.s32.totalorder %s1125_s1, %s1444_s28  ;;  %p1450_p4 = scmp.lt.s32.totalorder %s1444_s28, %s1444_s28 }
 0x127   :  { %v467_v39 = vpop.f32.mrf.mxu1  ;;  %v727_v53 = vcombine.low %v702_v44, %v709_v40  ;;  %v718_v61 = vrot.slane %v711_v50, %v1576_v5  ;;  %v1033_v40 = vld [vmem:[#allocation11 + $0x48] sm:$0xff]  ;;  %v825_v50 = vsub.s32 0, %v1573_v3 }
 0x128   :  { %v478_v42 = vcombine.high %v467_v39, %v467_v39  ;;  %v485_v45 = vrot.slane %v467_v39, %v1576_v5  ;;  %v318_v46 = vrot.slane %v311_v34, %v1576_v5  ;;  %v502_v54 = vcombine.high %v501_v41, %v501_v41  ;;  %v1038_v34 = vld [vmem:[#allocation11 + $0x70] sm:$0xff]  ;;  %v1029_v44 = vld [vmem:[#allocation11 + $0x28] sm:$0xff]  ;;  %p1451_p5 = por %p1450_p4, %p1449_p3 }
 0x129   :  { %v310_v56 = vcombine.low %v302_v43, %v309_v49  ;;  %v734_v2 = vrot.slane %v727_v53, %v1576_v5  ;;  %v726_v11 = vcombine.low %v718_v61, %v725_v62  ;;  %v1034_v39 = vld [vmem:[#allocation11 + $0x50] sm:$0xff]  ;;  %v1024_v49 = vld [vmem:[#allocation11] sm:$0xff] }
 0x12a   :  { %v492_v47 = vrot.slane %v478_v42, %v1576_v5  ;;  %v493_v51 = vcombine.high %v485_v45, %v485_v45  ;;  %v326_v59 = vcombine.low %v318_v46, %v325_v48  ;;  %v533_v4 = vrot.slane %v502_v54, %v1576_v5  ;;  %v1031_v42 = vld [vmem:[#allocation11 + $0x38] sm:$0xff]  ;;  %v1030_v43 = vld [vmem:[#allocation11 + $0x30] sm:$0xff]  ;;  %v1025_v48 = vld [vmem:[#allocation11 + $0x8] sm:$0xff]  ;;  %p1452_p6 = pnand %p1451_p5, %p1445_p2 }
 0x12b   :  { %v329_v7 = vadd.f32 %v1138_v58, %v310_v56  ;;  %v742_v13 = vcombine.low %v734_v2, %v741_v1  ;;  %v1027_v46 = vld [vmem:[#allocation11 + $0x18] sm:$0xff]  ;;  %v826_v54 = vrot.slane %v821_v52, %v825_v50 }
 0x12c   :  { %v494_v55 = vcombine.high %v492_v47, %v492_v47  ;;  %v503_v57 = vcombine.low %v485_v45, %v493_v51  ;;  %v517_v0 = vrot.slane %v492_v47, %v1576_v5  ;;  %v330_v9 = vadd.f32 %v1138_v58, %v326_v59  ;;  %v1028_v45 = vld [vmem:[#allocation11 + $0x20] sm:$0xff]  ;;  %v1026_v47 = vld [vmem:[#allocation11 + $0x10] sm:$0xff]  ;;  %v1147_v59 = vld [vmem:[%s1686_s7] ss:$0 sm:$0xff] }
 0x12d   :  { %v829_v51 = vsub.s32 1, %v1573_v3  ;;  %v1148_v3 = vld [vmem:[%s1688_s9] ss:$0 sm:$0xff] }
 0x12e   :  { %v519_v60 = vcombine.low %v494_v55, %v501_v41  ;;  %v510_v63 = vrot.slane %v503_v57, %v1576_v5  ;;  %v1032_v41 = vld [vmem:[#allocation11 + $0x40] sm:$0xff] }
 0x12f   :  { %v830_v55 = vrot.slane %v821_v52, %v829_v51 }
 0x130   :  { %v526_v6 = vrot.slane %v519_v60, %v1576_v5  ;;  %v518_v8 = vcombine.low %v510_v63, %v517_v0 }
 0x132   :  { %v534_v10 = vcombine.low %v526_v6, %v533_v4  ;;  %v537_v12 = vadd.f32 %v518_v8, %v329_v7 }
 0x134   :  { %v538_v14 = vadd.f32 %v534_v10, %v330_v9  ;;  %v745_v15 = vadd.f32 %v726_v11, %v537_v12 }
 0x136   :  { %v746_v16 = vadd.f32 %v742_v13, %v538_v14  ;;  %v747_v17 = vmax.f32 %v745_v15, 0.0 }
 0x138   :  { %v748_v18 = vmax.f32 %v746_v16, 0.0  ;;  %v750_v19 = vsel %vm749_vm4, %v747_v17, -inf }
 0x139   :  { %v751_v20 = vrot.slane %v750_v19, 4 }
 0x13a   :  { %v757_v21 = vsel %vm749_vm4, %v748_v18, -inf }
 0x13b   :  { %v758_v22 = vrot.slane %v757_v21, 4  ;;  %v752_v23 = vmax.f32 %v750_v19, %v751_v20 }
 0x13d   :  { %v759_v24 = vmax.f32 %v757_v21, %v758_v22  ;;  %v753_v5 = vrot.slane %v752_v23, 2 }
 0x13f   :  { %v760_v25 = vrot.slane %v759_v24, 2  ;;  %v754_v26 = vmax.f32 %v752_v23, %v753_v5 }
 0x141   :  { %v761_v27 = vmax.f32 %v759_v24, %v760_v25  ;;  %v755_v28 = vrot.slane %v754_v26, 1 }
 0x143   :  { %v762_v29 = vrot.slane %v761_v27, 1  ;;  %v756_v30 = vmax.f32 %v754_v26, %v755_v28 }
 0x145   :  { %v763_v31 = vmax.f32 %v761_v27, %v762_v29 }
 0x147   :  { %v950_v33 = vsel %vm949_vm5, %v763_v31, %v756_v30 }
 0x148   :  { %1267 = vmatmul.mubr.f32.vlgmr.msra.gmra.mxu0 %v950_v33 }
 0x149   :  { %1270 = vmatpush3.msra.mxu0 %v1039_v32  ;;  %1301 = vmatprep.mubr.msk.f32.mxu0 %vm1486_vm3, %v1485_v38 }
 0x14a   :  { %1271 = vmatprep.subr.mxu0 %v1485_v38 }
 0x14b   :  { %1272 = vmatpush3.msra.mxu0 %v1038_v34 }
 0x14c   :  { %1273 = vmatprep.subr.mxu0 %v1485_v38 }
 0x14d   :  { %1274 = vmatpush3.msra.mxu0 %v1037_v35 }
 0x14e   :  { %1275 = vmatprep.subr.mxu0 %v1485_v38 }
 0x14f   :  { %1276 = vmatpush3.msra.mxu0 %v1036_v36 }
 0x150   :  { %1277 = vmatprep.subr.mxu0 %v1485_v38 }
 0x151   :  { %1278 = vmatpush3.msra.mxu0 %v1035_v37 }
 0x152   :  { %1279 = vmatprep.subr.mxu0 %v1485_v38 }
 0x153   :  { %1280 = vmatpush3.msra.mxu0 %v1034_v39 }
 0x154   :  { %1281 = vmatprep.subr.mxu0 %v1485_v38 }
 0x155   :  { %1282 = vmatpush3.msra.mxu0 %v1033_v40 }
 0x156   :  { %1283 = vmatprep.subr.mxu0 %v1485_v38 }
 0x157   :  { %1284 = vmatpush3.msra.mxu0 %v1032_v41 }
 0x158   :  { %1285 = vmatprep.subr.mxu0 %v1485_v38 }
 0x159   :  { %1286 = vmatpush3.msra.mxu0 %v1031_v42 }
 0x15a   :  { %1287 = vmatprep.subr.mxu0 %v1485_v38 }
 0x15b   :  { %1288 = vmatpush3.msra.mxu0 %v1030_v43 }
 0x15c   :  { %1289 = vmatprep.subr.mxu0 %v1485_v38 }
 0x15d   :  { %1290 = vmatpush3.msra.mxu0 %v1029_v44  ;;  %v919_v53 = vpop.f32.mrf.mxu1 }
 0x15e   :  { %1291 = vmatprep.subr.mxu0 %v1485_v38  ;;  %v920_v57 = vadd.f32 %v919_v53, %v826_v54 }
 0x15f   :  { %1292 = vmatpush3.msra.mxu0 %v1028_v45  ;;  %v921_v56 = vpop.f32.mrf.mxu1 }
 0x160   :  { %1293 = vmatprep.subr.mxu0 %v1485_v38  ;;  %v922_v58 = vadd.f32 %v921_v56, %v830_v55 }
 0x161   :  { %1294 = vmatpush3.msra.mxu0 %v1027_v46 }
 0x162   :  { %1295 = vmatprep.subr.mxu0 %v1485_v38  ;;  %v1022_v60 = vmul.f32 %v922_v58, %v920_v57 }
 0x163   :  { %1296 = vmatpush3.msra.mxu0 %v1026_v47 }
 0x164   :  { %1297 = vmatprep.subr.mxu0 %v1485_v38 }
 0x165   :  { %1298 = vmatpush3.msra.mxu0 %v1025_v48 }
 0x166   :  { %1299 = vmatprep.subr.mxu0 %v1485_v38 }
 0x167   :  { %1300 = vmatpush3.msra.mxu0 %v1024_v49 }
 0x208   :  { %v1018_v38 = vpop.f32.mrf.mxu0 }
 0x209   :  { %v1019_v61 = vadd.f32 %v1147_v59, %v1018_v38 }
 0x20a   :  { %v1268_v62 = vpop.f32.mrf.mxu0 }
 0x20b   :  { %v1023_v63 = vmul.f32 %v1022_v60, %v1019_v61 }
 0x20d   :  { %1302 = vmatmul.mubr.f32.vlgmr.msra.gmra.mxu0 %v1023_v63 }
 0x2cd   :  { %v1113_v0 = vpop.f32.mrf.mxu0 }
 0x2ce   :  { %v1114_v1 = vadd.f32 %v1148_v3, %v1113_v0 }
 0x2cf   :  { %v1303_v2 = vpop.f32.mrf.mxu0 }
 0x2d0   :  { %1117 = vst [vmem:[#allocation13] sm:$0x3] %v1114_v1 }
 0x2d1   :  { %1455 = shalt.err (!%p1452_p6)
}
 0x2d2   :  { %1127 = dma.vmem_to_hbm [thread:$0]  %s1125_s1, 32, %s1689_s10, [#allocation4]  }
 0x2d3   :  { %1472 = dma.done.wait [#allocation4], 32  }
 0x2d4   :  { %1473 = vsyncadd [#allocation4], 4294967264 }
 0x2d5   :  { %1131 = vsyncpa [#allocation3], 1 }
 0x2d6   :  { %1132 = vsyncpa [#allocation6], 1 }
 0x2d7   :  { %1133 = vsyncpa [#allocation9], 1 }
 0x2d8   :  { %1134 = vsyncpa [#allocation12], 1 }
 0x2d9   :  { %1135 = vsyncpa [#allocation4], 1 }

</bundles_post_ra>
